<compile_context>
chip_gen: v7x
topology: tpu7x:2x2x1
jax: 0.10.0
libtpu: 0.0.40
codegen_flags: <defaults>
</compile_context>

<pallas_src>
import jax
import jax.numpy as jnp
from jax.experimental import pallas as pl
from jax.experimental.pallas import tpu as pltpu


def _round_up(x, m):
    return ((x + m - 1) // m) * m


def _xavier_uniform(key, shape, dtype=jnp.float32):
    """torch.nn.init.xavier_uniform_ on a 2-D tensor (fan_in=rows, fan_out=cols)."""
    fan_in, fan_out = shape[-2], shape[-1]
    limit = (6.0 / (fan_in + fan_out)) ** 0.5
    return jax.random.uniform(key, shape, dtype, minval=-limit, maxval=limit)


def _factorized_dense_kernel(x_ref, w_ref, bias_ref, o_ref):
    # x_ref: (tm, d_i) bf16, w_ref: (d_i, tn) bf16, bias_ref: (1, tn) f32.
    acc = jnp.dot(x_ref[...], w_ref[...], preferred_element_type=jnp.float32)
    o_ref[...] = (acc + bias_ref[...]).astype(o_ref.dtype)


def _pick_row_tile(M, tm_max=512):
    """Pick tm (multiple of 16) minimizing padded junk rows; tie-break larger tm."""
    Mp16 = _round_up(max(M, 16), 16)
    best = None
    for tm in (512, 384, 256, 192, 128, 96, 64, 48, 32, 16):
        if tm > tm_max:
            continue
        Mp = _round_up(Mp16, tm)
        key = (Mp - Mp16, -tm)
        if best is None or key < best[0]:
            best = (key, tm, Mp)
    return best[1], best[2]


def factorized_dense(x, uu, vv, mask=None, bias=None, *, l1=0.0, training=True,
                     tm_max=512, tn_max=1024,
                     compute_dtype=jnp.bfloat16, out_dtype=jnp.bfloat16,
                     vmem_budget_bytes=48 * 1024 * 1024):
    d_i, rank = uu.shape
    _, d_o = vv.shape
    del rank  # folded into the wrapper-side W precompute
    lead = x.shape[:-1]

    # ---- W = uu @ vv + prune(mask): tiny, done once in XLA, pruned in f32,
    # then cast to the compute dtype (halves weight-side HBM traffic). -------
    w = jnp.dot(uu.astype(jnp.float32), vv.astype(jnp.float32),
                preferred_element_type=jnp.float32)
    if mask is not None:                      # has_mask=True path
        m = mask.astype(jnp.float32)
        if not training:                      # eval-mode prune BEFORE the cast
            m = jnp.where(jnp.abs(m) < l1, 0.0, m)
        w = w + m
    w = w.astype(compute_dtype)

    if bias is None:                          # bias=False path
        bias = jnp.zeros((d_o,), jnp.float32)

    # x: cast directly to the compute dtype (no f32 intermediate), then pad.
    xm = x.reshape(-1, d_i).astype(compute_dtype)
    M = xm.shape[0]

    # ---- tiling ----------------------------------------------------------
    tm, Mp = _pick_row_tile(M, tm_max)                  # rows (sublanes)
    d_o128 = _round_up(d_o, 128)                        # lane-dense outputs
    tn = min(_round_up(tn_max, 128), d_o128)

    xb = jnp.dtype(compute_dtype).itemsize
    ob = jnp.dtype(out_dtype).itemsize

    def footprint(tm_, tn_):                            # double-buffered VMEM bytes
        return (2 * tm_ * d_i * xb       # x
                + 2 * d_i * tn_ * xb     # W
                + 2 * tn_ * 4            # bias
                + 2 * tm_ * tn_ * ob)    # output

    # Shrink tiles until the working set fits the budget (v7x-safe default).
    while footprint(tm, tn) > vmem_budget_bytes and tn > 128:
        tn = max(128, ((tn // 2) // 128) * 128)
    while footprint(tm, tn) > vmem_budget_bytes and tm > 16:
        tm = max(16, ((tm // 2) // 16) * 16)

    d_op = _round_up(d_o128, tn)
    n_i = Mp // tm
    n_j = d_op // tn

    xp = jnp.pad(xm, ((0, Mp - M), (0, 0)))
    wp = jnp.pad(w, ((0, 0), (0, d_op - d_o)))
    biasp = jnp.pad(bias.reshape(1, d_o).astype(jnp.float32),
                    ((0, 0), (0, d_op - d_o)))

    vmem_limit = int(min(64 * 1024 * 1024,
                         max(32 * 1024 * 1024, footprint(tm, tn) + 16 * 1024 * 1024)))

    flops = 2 * Mp * d_i * d_op
    bytes_accessed = (n_j * Mp * d_i * xb        # x (re-streamed per d_o sweep)
                      + d_i * d_op * xb          # W
                      + d_op * 4                 # bias
                      + Mp * d_op * ob)          # output

    out = pl.pallas_call(
        _factorized_dense_kernel,
        out_shape=jax.ShapeDtypeStruct((Mp, d_op), out_dtype),
        grid_spec=pltpu.PrefetchScalarGridSpec(
            num_scalar_prefetch=0,
            grid=(n_j, n_i),                               # both axes independent
            in_specs=[
                pl.BlockSpec((tm, d_i), lambda j, i: (i, 0)),   # x row strip
                pl.BlockSpec((d_i, tn), lambda j, i: (0, j)),   # W column tile
                pl.BlockSpec((1, tn), lambda j, i: (0, j)),     # bias column tile
            ],
            out_specs=pl.BlockSpec((tm, tn), lambda j, i: (i, j)),
        ),
        compiler_params=pltpu.CompilerParams(
            dimension_semantics=("parallel", "parallel"),       # megacore-friendly
            vmem_limit_bytes=vmem_limit,
        ),
        cost_estimate=pl.CostEstimate(flops=int(flops), transcendentals=0,
                                      bytes_accessed=int(bytes_accessed)),
    )(xp, wp, biasp)

    return out[:M, :d_o].reshape(*lead, d_o)


def _reference(x, uu, vv, mask, bias, *, l1, training):
    """Pure-JAX f32 reference of the module forward."""
    w = uu @ vv
    if mask is not None:
        m = mask if training else jnp.where(jnp.abs(mask) < l1, 0.0, mask)
        w = w + m
    out = jnp.dot(x.reshape(-1, x.shape[-1]), w, preferred_element_type=jnp.float32)
    if bias is not None:
        out = out + bias
    return out.reshape(*x.shape[:-1], w.shape[-1])


if __name__ == "__main__":
    # Small shapes consistent with the module: batch=2, seq=8, d_i=32, d_o=64, rank=1
    B, S, d_i, d_o, rank = 2, 8, 32, 64, 1

    key = jax.random.PRNGKey(0)
    kx, ku, kv, kb, km = jax.random.split(key, 5)

    x = jax.random.normal(kx, (B, S, d_i), dtype=jnp.float32)
    uu = _xavier_uniform(ku, (d_i, rank))
    vv = _xavier_uniform(kv, (rank, d_o))
    bias = _xavier_uniform(kb, (1, d_o)).reshape(d_o)   # init via unsqueeze(0), like torch
    mask = _xavier_uniform(km, (d_i, d_o))

    tol = dict(atol=5e-2, rtol=5e-2)   # bf16 operands + bf16 output store

    # training mode (prune is identity)
    out = jax.block_until_ready(
        factorized_dense(x, uu, vv, mask, bias, l1=0.0, training=True))
    ref = _reference(x, uu, vv, mask, bias, l1=0.0, training=True)
    assert out.shape == (B, S, d_o)
    err = float(jnp.max(jnp.abs(out.astype(jnp.float32) - ref)))
    assert jnp.allclose(out.astype(jnp.float32), ref, **tol), err

    # eval mode with pruning threshold
    out_e = jax.block_until_ready(
        factorized_dense(x, uu, vv, mask, bias, l1=0.05, training=False))
    ref_e = _reference(x, uu, vv, mask, bias, l1=0.05, training=False)
    err_e = float(jnp.max(jnp.abs(out_e.astype(jnp.float32) - ref_e)))
    assert jnp.allclose(out_e.astype(jnp.float32), ref_e, **tol), err_e

    # has_mask=False, bias=False path
    out_n = jax.block_until_ready(
        factorized_dense(x, uu, vv, None, None, l1=0.0, training=True))
    ref_n = _reference(x, uu, vv, None, None, l1=0.0, training=True)
    err_n = float(jnp.max(jnp.abs(out_n.astype(jnp.float32) - ref_n)))
    assert jnp.allclose(out_n.astype(jnp.float32), ref_n, **tol), err_n

    print("KERNEL_OK")
</pallas_src>

<mosaic_0001>
module attributes {stable_mosaic.version = 11 : i64} {
  func.func @_factorized_dense_kernel(%arg0: i32, %arg1: i32, %arg2: memref<16x32xbf16, #tpu.memory_space<vmem>>, %arg3: memref<32x128xbf16, #tpu.memory_space<vmem>>, %arg4: memref<1x128xf32, #tpu.memory_space<vmem>>, %arg5: memref<16x128xbf16, #tpu.memory_space<vmem>>) attributes {dimension_semantics = [#tpu.dimension_semantics<parallel>, #tpu.dimension_semantics<parallel>], iteration_bounds = array<i64: 1, 1>, scalar_prefetch = 0 : i64, scratch_operands = 0 : i64, tpu.core_type = #tpu.core_type<tc>, window_params = [{transform_indices = @transform_0, window_bounds = array<i64: 16, 32>}, {transform_indices = @transform_1, window_bounds = array<i64: 32, 128>}, {transform_indices = @transform_2, window_bounds = array<i64: 1, 128>}, {transform_indices = @transform_3, window_bounds = array<i64: 16, 128>}]} {
    %c0 = arith.constant 0 : index
    %c0_0 = arith.constant 0 : index
    %0 = vector.load %arg2[%c0, %c0_0] : memref<16x32xbf16, #tpu.memory_space<vmem>>, vector<16x32xbf16>
    %c0_1 = arith.constant 0 : index
    %c0_2 = arith.constant 0 : index
    %1 = vector.load %arg3[%c0_1, %c0_2] : memref<32x128xbf16, #tpu.memory_space<vmem>>, vector<32x128xbf16>
    %cst = arith.constant dense<0.000000e+00> : vector<16x128xf32>
    %2 = tpu.matmul %0, %1, %cst {dimension_numbers = #tpu.dot_dimension_numbers<[1], [0], [0], [1], [0, 0, 1, 1], [], []>} : vector<16x32xbf16>, vector<32x128xbf16>, vector<16x128xf32> -> vector<16x128xf32>
    %c0_3 = arith.constant 0 : index
    %c0_4 = arith.constant 0 : index
    %3 = vector.load %arg4[%c0_3, %c0_4] : memref<1x128xf32, #tpu.memory_space<vmem>>, vector<1x128xf32>
    %4 = vector.broadcast %3 : vector<1x128xf32> to vector<16x128xf32>
    %5 = arith.addf %2, %4 : vector<16x128xf32>
    %6 = arith.truncf %5 : vector<16x128xf32> to vector<16x128xbf16>
    %c0_5 = arith.constant 0 : index
    %c0_6 = arith.constant 0 : index
    %7 = vector.load %arg5[%c0_5, %c0_6] : memref<16x128xbf16, #tpu.memory_space<vmem>>, vector<16x128xbf16>
    tpu.vector_store %arg5[%c0_5, %c0_6], %6 {strides = array<i32>} : memref<16x128xbf16, #tpu.memory_space<vmem>>, vector<16x128xbf16>,
    return
  }
  func.func @transform_0(%arg0: i32, %arg1: i32) -> (i32, i32) {
    %c0_i32 = arith.constant 0 : i32
    %c0_i32_0 = arith.constant 0 : i32
    return %arg1, %c0_i32 : i32, i32
  }
  func.func @transform_1(%arg0: i32, %arg1: i32) -> (i32, i32) {
    %c0_i32 = arith.constant 0 : i32
    %c0_i32_0 = arith.constant 0 : i32
    return %c0_i32, %arg0 : i32, i32
  }
  func.func @transform_2(%arg0: i32, %arg1: i32) -> (i32, i32) {
    %c0_i32 = arith.constant 0 : i32
    %c0_i32_0 = arith.constant 0 : i32
    return %c0_i32, %arg0 : i32, i32
  }
  func.func @transform_3(%arg0: i32, %arg1: i32) -> (i32, i32) {
    %c0_i32 = arith.constant 0 : i32
    return %arg1, %arg0 : i32, i32
  }
}

</mosaic_0001>

<bundles_post_ra>
// kernel: tpu_custom_call.1
= control target key start
LH: loop header
LB: loop body
LE: loop exit
PB: predicated region body
PF: predicated region fallthrough
CT: control target
= control target key end

     0   :  { %8 = vsyncpa [#allocation3], 0  ;;  %s329_s0 = inlined_call_operand.hbm [shape: bf16[16,32], index: 0, kind: input, shape index: {}]   ;;  %s330_s1 = inlined_call_operand.hbm [shape: bf16[32,128], index: 1, kind: input, shape index: {}]   ;;  %s331_s2 = inlined_call_operand.vmem [shape: f32[1,128], index: 2, kind: input, shape index: {}]   ;;  %s332_s3 = inlined_call_operand.hbm [shape: bf16[16,128], index: 3, kind: output, shape index: {}]  }
   0x1   :  { %9 = vsyncpa [#allocation6], 0 }
   0x2   :  { %10 = vsyncpa [#allocation4], 0  ;;  %s254_s12 = smov [#allocation2]   ;;  %s182_s16 = scalar_lea.hbm %s329_s0, 128 }
   0x3   :  { %s16_s13 = sshll.u32 %s254_s12, 4  ;;  %p183_p0 = scmp.ne.s32.totalorder %s329_s0, %s182_s16  ;;  %s17_s13 = int_to_ptr.vmem [resolvable:$true] %s16_s13 }
   0x4   :  { %p186_p1 = scmp.lt.u32.totalorder %s182_s16, %s329_s0 }
   0x6   :  { %p188_p2 = pnand %p186_p1, %p183_p0 }
   0x8   :  { %191 = shalt.err (!%p188_p2)
}
   0x9   :  { %s192_s21 = scalar_lea.vmem %s17_s13, 128  ;;  %p197_p4 = scmp.lt.s32.totalorder %s17_s13, %s17_s13 }
   0xa   :  { %p193_p3 = scmp.ne.s32.totalorder %s17_s13, %s192_s21  ;;  %p198_p5 = scmp.lt.s32.totalorder %s192_s21, %s192_s21 }
   0xc   :  { %p199_p6 = por %p198_p5, %p197_p4 }
   0xe   :  { %p200_p7 = pnand %p199_p6, %p193_p3 }
  0x10   :  { %203 = shalt.err (!%p200_p7)
}
  0x11   :  { %s255_s22 = smov 64   ;;  %s256_s23 = smov 4  }
  0x12   :  { %22 = dma.hbm_to_vmem [thread:$0]  %s329_s0, 128, %s17_s13, [#allocation3], %s255_s22, %s255_s22, %s256_s23  }
  0x13   :  { %s257_s26 = smov [#allocation5]   ;;  %s204_s30 = scalar_lea.hbm %s330_s1, 256 }
  0x14   :  { %s28_s27 = sshll.u32 %s257_s26, 4  ;;  %p205_p8 = scmp.ne.s32.totalorder %s330_s1, %s204_s30  ;;  %s29_s27 = int_to_ptr.vmem [resolvable:$true] %s28_s27 }
  0x15   :  { %p208_p9 = scmp.lt.u32.totalorder %s204_s30, %s330_s1 }
  0x17   :  { %p210_p10 = pnand %p208_p9, %p205_p8 }
  0x19   :  { %213 = shalt.err (!%p210_p10)
}
  0x1a   :  { %s214_s8 = scalar_lea.vmem %s29_s27, 256  ;;  %p219_p12 = scmp.lt.s32.totalorder %s29_s27, %s29_s27 }
  0x1b   :  { %p215_p11 = scmp.ne.s32.totalorder %s29_s27, %s214_s8  ;;  %p220_p13 = scmp.lt.s32.totalorder %s214_s8, %s214_s8 }
  0x1d   :  { %p221_p0 = por %p220_p13, %p219_p12 }
  0x1f   :  { %p222_p1 = pnand %p221_p0, %p215_p11 }
  0x21   :  { %225 = shalt.err (!%p222_p1)
}
  0x22   :  { %34 = dma.hbm_to_vmem [thread:$0]  %s330_s1, 256, %s29_s27, [#allocation6], %s255_s22, %s255_s22, %s256_s23  }
  0x23   :  { %248 = dma.done.wait [#allocation3], 128  }
  0x24   :  { %249 = vsyncadd [#allocation3], 4294967168 }
  0x25   :  { %250 = dma.done.wait [#allocation6], 256  }
  0x26   :  { %251 = vsyncadd [#allocation6], 4294967040  ;;  %v258_v0 = vmov 0.0   ;;  %vm259_vm0 = vmmov 0   ;;  %v179_v1 = vld [vmem:[#allocation5] sm:$0xff]   ;;  %v180_v2 = vld [vmem:[#allocation5 + $0x8] sm:$0xff]  }
  0x27   :  { %164 = vmatprep.subr.bf16.mxu0 %v258_v0  ;;  %168 = vmatprep.mubr.msk.bf16.mxu0 %vm259_vm0, %v258_v0  ;;  %v181_v3 = vld [vmem:[#allocation2] sm:$0xff]   ;;  %vm74_vm1 = vcmask 261120   ;;  %s260_s1 = smov [#allocation7]  }
  0x28   :  { %165 = vmatpush3.bf16.msra.mxu0 %v179_v1  ;;  %v147_v4 = vld [vmem:[%s331_s2] ss:$0 sm:$0xff]  ;;  %s134_s12 = sshll.u32 %s260_s1, 4  ;;  %s135_s12 = int_to_ptr.vmem [resolvable:$true] %s134_s12 }
  0x29   :  { %166 = vmatprep.subr.bf16.mxu0 %v258_v0  ;;  %s226_s13 = scalar_lea.vmem %s135_s12, 128  ;;  %p231_p3 = scmp.lt.s32.totalorder %s135_s12, %s135_s12 }
  0x2a   :  { %p227_p2 = scmp.ne.s32.totalorder %s135_s12, %s226_s13  ;;  %p232_p4 = scmp.lt.s32.totalorder %s226_s13, %s226_s13 }
  0x2c   :  { %167 = vmatpush3.bf16.msra.mxu0 %v180_v2  ;;  %p233_p5 = por %p232_p4, %p231_p3 }
  0x2e   :  { %p234_p6 = pnand %p233_p5, %p227_p2 }
  0x2f   :  { %169 = vmatmul.mubr.msk.bf16.vlgmr.msra.gmra.mrb[0].mxu0 %vm74_vm1, %v181_v3 }
 0x102   :  { %v112_v5 = vpop.f32.mrb[0].mxu0 }
 0x103   :  { %v170_v6 = vpop.f32.mrb[1].mxu0  ;;  %v113_v8 = vadd.f32 %v147_v4, %v112_v5 }
 0x104   :  { %v115_v7 = vpop.f32.mrb[2].mxu0 }
 0x105   :  { %v116_v9 = vadd.f32 %v147_v4, %v115_v7  ;;  %v171_v10 = vpop.f32.mrb[3].mxu0 }
 0x107   :  { %v159_v11 = vpack.c.bf16 %v116_v9, %v113_v8 }
 0x109   :  { %160 = vst [vmem:[#allocation7] sm:$0xff] %v159_v11  }
 0x10a   :  { %237 = shalt.err (!%p234_p6)
}
 0x10b   :  { %s238_s15 = scalar_lea.hbm %s332_s3, 128 }
 0x10c   :  { %p239_p7 = scmp.ne.s32.totalorder %s332_s3, %s238_s15  ;;  %p242_p8 = scmp.lt.u32.totalorder %s238_s15, %s332_s3 }
 0x10e   :  { %p244_p9 = pnand %p242_p8, %p239_p7 }
 0x110   :  { %247 = shalt.err (!%p244_p9)
}
 0x111   :  { %140 = dma.vmem_to_hbm [thread:$0]  %s135_s12, 128, %s332_s3, [#allocation4], %s255_s22, %s255_s22, %s256_s23  }
 0x112   :  { %252 = dma.done.wait [#allocation4], 128  }
 0x113   :  { %253 = vsyncadd [#allocation4], 4294967168 }
 0x114   :  { %144 = vsyncpa [#allocation3], 1 }
 0x115   :  { %145 = vsyncpa [#allocation6], 1 }
 0x116   :  { %146 = vsyncpa [#allocation4], 1 }

</bundles_post_ra>
